<compile_context>
chip_gen: v6e
topology: v6e:2x2x1
jax: 0.10.0
libtpu: 0.0.40
codegen_flags: <defaults>
</compile_context>

<pallas_src>
import functools

import jax
import jax.numpy as jnp
from jax.experimental import pallas as pl
from jax.experimental.pallas import tpu as pltpu


def _round_up(a: int, b: int) -> int:
    return (a + b - 1) // b * b


def _default_tiles():
    """Generation-aware (tm, th, vmem_limit_bytes) defaults."""
    try:
        kind = jax.devices()[0].device_kind.lower()
    except Exception:  # pragma: no cover
        kind = ""
    if "v7" in kind:            # 64 MiB VMEM / TC, 3.2 TB/s HBM -> small tiles OK
        return 512, 256, 48 * 1024 * 1024
    if "v6" in kind:            # needs ~700 flops/byte -> big token tile
        return 1024, 512, 96 * 1024 * 1024
    if "v5" in kind:            # 128 MiB VMEM, modest roofline
        return 512, 512, 96 * 1024 * 1024
    return 512, 256, 48 * 1024 * 1024


def _maybe_single_buffered_spec(block_shape, index_map):
    """x / out tiles are constant across the reduction axis; double-buffering
    them only wastes VMEM.  Fall back cleanly if pipeline_mode is unsupported."""
    if hasattr(pl, "Buffered"):
        try:
            return pl.BlockSpec(block_shape, index_map,
                                pipeline_mode=pl.Buffered(1))
        except TypeError:
            pass
    return pl.BlockSpec(block_shape, index_map)


# ----------------------------------------------------------------------------
# One-time weight preparation (NOT in the per-call path).
# ----------------------------------------------------------------------------
def prepare_glu_weights(w1_t, w3_t, w2_t, *, th=None,
                        compute_dtype=jnp.bfloat16):
    """w1_t/w3_t: [D, H] (= W1^T / W3^T), w2_t: [H, D] (= W2^T).

    Returns (w13b, w2b):
      w13b: [n_h, Dp, 2*th]  -- per-H-tile slab, cols [0:th]=W1^T, [th:2th]=W3^T
      w2b : [n_h, th, Dp]
    Pre-padded to lane-friendly sizes and pre-cast to the compute dtype so the
    jitted forward touches weights exactly once per call (inside the kernel).
    """
    D, H = w1_t.shape
    if th is None:
        th = _default_tiles()[1]

    Dp = _round_up(D, 128)
    Hp128 = _round_up(H, 128)
    th = min(th, Hp128)                      # stays a multiple of 128
    Hp = _round_up(Hp128, th)
    n_h = Hp // th

    w1p = jnp.pad(w1_t.astype(compute_dtype), ((0, Dp - D), (0, Hp - H)))
    w3p = jnp.pad(w3_t.astype(compute_dtype), ((0, Dp - D), (0, Hp - H)))
    w2p = jnp.pad(w2_t.astype(compute_dtype), ((0, Hp - H), (0, Dp - D)))

    # Swizzle into H-tile-major slabs: each grid step's weights are contiguous.
    w1b = w1p.reshape(Dp, n_h, th).transpose(1, 0, 2)     # (n_h, Dp, th)
    w3b = w3p.reshape(Dp, n_h, th).transpose(1, 0, 2)     # (n_h, Dp, th)
    w13b = jnp.concatenate([w1b, w3b], axis=-1)           # (n_h, Dp, 2*th)
    w2b = w2p.reshape(n_h, th, Dp)                        # (n_h, th, Dp)

    return jax.device_put(w13b), jax.device_put(w2b)


# ----------------------------------------------------------------------------
# Kernel
# ----------------------------------------------------------------------------
def glu_kernel(x_ref, w13_ref, w2_ref, o_ref, acc_ref):
    # x_ref:   (tm, Dp)        token tile (compute dtype), constant over k
    # w13_ref: (1, Dp, 2*th)   fused W1^T | W3^T slab for H-tile k
    # w2_ref:  (1, th, Dp)     W2^T slab for H-tile k
    # o_ref:   (tm, Dp)        output tile (resident across the H axis)
    # acc_ref: (tm, Dp)        f32 accumulator scratch
    k = pl.program_id(1)
    th = w2_ref.shape[1]

    @pl.when(k == 0)
    def _():
        acc_ref[...] = jnp.zeros_like(acc_ref)

    x = x_ref[...]
    # Single fused up-projection on the MXU: (tm, Dp) @ (Dp, 2*th) -> f32.
    h13 = jnp.dot(x, w13_ref[0], preferred_element_type=jnp.float32)
    h1 = h13[:, :th]
    h3 = h13[:, th:]
    # SiLU gate in f32: sigmoid -> EUP, multiplies -> VPU (off the MXU slot).
    gated = (h1 * jax.nn.sigmoid(h1)) * h3
    # Down-projection of this hidden slice, accumulated into the output tile.
    acc_ref[...] += jnp.dot(gated.astype(w2_ref.dtype), w2_ref[0],
                            preferred_element_type=jnp.float32)

    @pl.when(k == pl.num_programs(1) - 1)
    def _():
        o_ref[...] = acc_ref[...].astype(o_ref.dtype)


# ----------------------------------------------------------------------------
# Forward
# ----------------------------------------------------------------------------
@functools.partial(jax.jit, static_argnames=("tm", "vmem_limit_bytes"))
def _glu_forward_impl(x, w13b, w2b, *, tm, vmem_limit_bytes):
    B, S, D = x.shape
    n_h, Dp, two_th = w13b.shape
    th = two_th // 2
    compute_dtype = w13b.dtype
    out_dtype = x.dtype
    M = B * S

    tm = max(8, min(tm, _round_up(M, 8)))
    Mp = _round_up(M, tm)

    # Only the activations are padded / cast per call (cheap vs. the weights).
    x2 = jnp.pad(x.reshape(M, D).astype(compute_dtype),
                 ((0, Mp - M), (0, Dp - D)))

    grid = (Mp // tm, n_h)                  # M parallel, H (reduction) last

    out2 = pl.pallas_call(
        glu_kernel,
        out_shape=jax.ShapeDtypeStruct((Mp, Dp), out_dtype),
        grid=grid,
        in_specs=[
            _maybe_single_buffered_spec((tm, Dp), lambda i, k: (i, 0)),  # x
            pl.BlockSpec((1, Dp, 2 * th), lambda i, k: (k, 0, 0)),       # W1|W3
            pl.BlockSpec((1, th, Dp), lambda i, k: (k, 0, 0)),           # W2
        ],
        out_specs=pl.BlockSpec((tm, Dp), lambda i, k: (i, 0)),
        scratch_shapes=[pltpu.VMEM((tm, Dp), jnp.float32)],
        compiler_params=pltpu.CompilerParams(
            dimension_semantics=("parallel", "arbitrary"),
            vmem_limit_bytes=vmem_limit_bytes,
        ),
    )(x2, w13b, w2b)

    return out2[:M, :D].reshape(B, S, D)


def glu_forward(x, w13b, w2b, *, tm=None, vmem_limit_bytes=None):
    """x: [B, S, D]; w13b/w2b from prepare_glu_weights. Returns [B, S, D]."""
    d_tm, _, d_vmem = _default_tiles()
    if tm is None:
        tm = d_tm
    if vmem_limit_bytes is None:
        vmem_limit_bytes = d_vmem
    return _glu_forward_impl(x, w13b, w2b, tm=tm,
                             vmem_limit_bytes=vmem_limit_bytes)


# ----------------------------------------------------------------------------
# References
# ----------------------------------------------------------------------------
def glu_reference(x, w1_t, w3_t, w2_t, compute_dtype=jnp.bfloat16):
    """Reference mimicking the kernel's bf16-in / f32-accumulate numerics."""
    xb = x.astype(compute_dtype)
    h1 = jnp.dot(xb, w1_t.astype(compute_dtype),
                 preferred_element_type=jnp.float32)
    h3 = jnp.dot(xb, w3_t.astype(compute_dtype),
                 preferred_element_type=jnp.float32)
    gated = (h1 * jax.nn.sigmoid(h1)) * h3
    out = jnp.dot(gated.astype(compute_dtype), w2_t.astype(compute_dtype),
                  preferred_element_type=jnp.float32)
    return out.astype(x.dtype)


if __name__ == "__main__":
    # Module defaults: hidden_dim = multiple_of * ceil((2*4*dim/3)/multiple_of)
    dim = 64
    multiple_of = 4
    hidden_dim = 4 * dim
    hidden_dim = int(2 * hidden_dim / 3)
    hidden_dim = multiple_of * ((hidden_dim + multiple_of - 1) // multiple_of)  # 172

    B, S = 2, 8

    key = jax.random.PRNGKey(0)
    kx, k1, k2, k3 = jax.random.split(key, 4)
    x = jax.random.normal(kx, (B, S, dim), dtype=jnp.float32)
    # PyTorch nn.Linear weight is (out_features, in_features); we store transposed.
    w1_t = (jax.random.normal(k1, (hidden_dim, dim), dtype=jnp.float32) * 0.02).T
    w2_t = (jax.random.normal(k2, (dim, hidden_dim), dtype=jnp.float32) * 0.02).T
    w3_t = (jax.random.normal(k3, (hidden_dim, dim), dtype=jnp.float32) * 0.02).T

    # One-time weight preparation (pad + cast + swizzle), outside the hot path.
    w13b, w2b = prepare_glu_weights(w1_t, w3_t, w2_t)

    out = glu_forward(x, w13b, w2b)
    out = jax.block_until_ready(out)
    assert out.shape == (B, S, dim)

    # bf16 matmul inputs with f32 accumulation -> tolerances loosened vs pure f32.
    ref = glu_reference(x, w1_t, w3_t, w2_t)
    assert jnp.allclose(out, ref, atol=1e-3, rtol=1e-2), "mismatch vs reference"

    # Also sanity-check against the pure-f32 math (looser, bf16 rounding).
    ref_f32 = (jax.nn.silu(x @ w1_t) * (x @ w3_t)) @ w2_t
    assert jnp.allclose(out, ref_f32, atol=5e-3, rtol=5e-2), "mismatch vs f32 reference"

    print("KERNEL_OK")
</pallas_src>

<mosaic_0001>
module attributes {stable_mosaic.version = 11 : i64} {
  func.func @glu_kernel(%arg0: i32, %arg1: i32, %arg2: memref<16x128xbf16, #tpu.memory_space<vmem>>, %arg3: memref<1x128x512xbf16, #tpu.memory_space<vmem>>, %arg4: memref<1x256x128xbf16, #tpu.memory_space<vmem>>, %arg5: memref<16x128xf32, #tpu.memory_space<vmem>>, %arg6: memref<16x128xf32, #tpu.memory_space<vmem>>) attributes {dimension_semantics = [#tpu.dimension_semantics<parallel>, #tpu.dimension_semantics<arbitrary>], iteration_bounds = array<i64: 1, 1>, scalar_prefetch = 0 : i64, scratch_operands = 1 : i64, tpu.core_type = #tpu.core_type<tc>, window_params = [{pipeline_mode = #tpu.pipeline_mode<synchronous>, transform_indices = @transform_0, window_bounds = array<i64: 16, 128>}, {transform_indices = @transform_1, window_bounds = array<i64: 1, 128, 512>}, {transform_indices = @transform_2, window_bounds = array<i64: 1, 256, 128>}, {transform_indices = @transform_3, window_bounds = array<i64: 16, 128>}]} {
    %c0_i32 = arith.constant 0 : i32
    %0 = arith.cmpi eq, %arg1, %c0_i32 : i32
    %1 = arith.extui %0 : i1 to i32
    %c0_i32_0 = arith.constant 0 : i32
    %2 = arith.cmpi ne, %1, %c0_i32_0 : i32
    scf.if %2 {
      %cst_16 = arith.constant 0.000000e+00 : f32
      %26 = vector.broadcast %cst_16 : f32 to vector<16x128xf32>
      %c0_17 = arith.constant 0 : index
      %c0_18 = arith.constant 0 : index
      %27 = vector.load %arg6[%c0_17, %c0_18] : memref<16x128xf32, #tpu.memory_space<vmem>>, vector<16x128xf32>
      tpu.vector_store %arg6[%c0_17, %c0_18], %26 {strides = array<i32>} : memref<16x128xf32, #tpu.memory_space<vmem>>, vector<16x128xf32>,
    } else {
    }
    %c0 = arith.constant 0 : index
    %c0_1 = arith.constant 0 : index
    %3 = vector.load %arg2[%c0, %c0_1] : memref<16x128xbf16, #tpu.memory_space<vmem>>, vector<16x128xbf16>
    %c0_2 = arith.constant 0 : index
    %c0_3 = arith.constant 0 : index
    %c0_4 = arith.constant 0 : index
    %4 = vector.load %arg3[%c0_2, %c0_3, %c0_4] : memref<1x128x512xbf16, #tpu.memory_space<vmem>>, vector<1x128x512xbf16>
    %5 = vector.shape_cast %4 : vector<1x128x512xbf16> to vector<128x512xbf16>
    %cst = arith.constant dense<0.000000e+00> : vector<16x512xf32>
    %6 = tpu.matmul %3, %5, %cst {dimension_numbers = #tpu.dot_dimension_numbers<[1], [0], [0], [1], [0, 0, 1, 1], [], []>} : vector<16x128xbf16>, vector<128x512xbf16>, vector<16x512xf32> -> vector<16x512xf32>
    %7 = vector.extract_strided_slice %6 {offsets = [0, 0], sizes = [16, 256], strides = [1, 1]} : vector<16x512xf32> to vector<16x256xf32>
    %8 = vector.extract_strided_slice %6 {offsets = [0, 256], sizes = [16, 256], strides = [1, 1]} : vector<16x512xf32> to vector<16x256xf32>
    %9 = arith.negf %7 : vector<16x256xf32>
    %10 = math.exp %9 : vector<16x256xf32>
    %cst_5 = arith.constant 1.000000e+00 : f32
    %11 = vector.broadcast %cst_5 : f32 to vector<16x256xf32>
    %12 = arith.addf %11, %10 : vector<16x256xf32>
    %13 = arith.divf %11, %12 : vector<16x256xf32>
    %14 = arith.mulf %7, %13 : vector<16x256xf32>
    %15 = arith.mulf %14, %8 : vector<16x256xf32>
    %c0_6 = arith.constant 0 : index
    %c0_7 = arith.constant 0 : index
    %16 = vector.load %arg6[%c0_6, %c0_7] : memref<16x128xf32, #tpu.memory_space<vmem>>, vector<16x128xf32>
    %17 = arith.truncf %15 : vector<16x256xf32> to vector<16x256xbf16>
    %c0_8 = arith.constant 0 : index
    %c0_9 = arith.constant 0 : index
    %c0_10 = arith.constant 0 : index
    %18 = vector.load %arg4[%c0_8, %c0_9, %c0_10] : memref<1x256x128xbf16, #tpu.memory_space<vmem>>, vector<1x256x128xbf16>
    %19 = vector.shape_cast %18 : vector<1x256x128xbf16> to vector<256x128xbf16>
    %cst_11 = arith.constant dense<0.000000e+00> : vector<16x128xf32>
    %20 = tpu.matmul %17, %19, %cst_11 {dimension_numbers = #tpu.dot_dimension_numbers<[1], [0], [0], [1], [0, 0, 1, 1], [], []>} : vector<16x256xbf16>, vector<256x128xbf16>, vector<16x128xf32> -> vector<16x128xf32>
    %21 = arith.addf %16, %20 : vector<16x128xf32>
    %c0_12 = arith.constant 0 : index
    %c0_13 = arith.constant 0 : index
    %22 = vector.load %arg6[%c0_12, %c0_13] : memref<16x128xf32, #tpu.memory_space<vmem>>, vector<16x128xf32>
    tpu.vector_store %arg6[%c0_12, %c0_13], %21 {strides = array<i32>} : memref<16x128xf32, #tpu.memory_space<vmem>>, vector<16x128xf32>,
    %c0_i32_14 = arith.constant 0 : i32
    %23 = arith.cmpi eq, %arg1, %c0_i32_14 : i32
    %24 = arith.extui %23 : i1 to i32
    %c0_i32_15 = arith.constant 0 : i32
    %25 = arith.cmpi ne, %24, %c0_i32_15 : i32
    scf.if %25 {
      %c0_16 = arith.constant 0 : index
      %c0_17 = arith.constant 0 : index
      %26 = vector.load %arg6[%c0_16, %c0_17] : memref<16x128xf32, #tpu.memory_space<vmem>>, vector<16x128xf32>
      %c0_18 = arith.constant 0 : index
      %c0_19 = arith.constant 0 : index
      %27 = vector.load %arg5[%c0_18, %c0_19] : memref<16x128xf32, #tpu.memory_space<vmem>>, vector<16x128xf32>
      tpu.vector_store %arg5[%c0_18, %c0_19], %26 {strides = array<i32>} : memref<16x128xf32, #tpu.memory_space<vmem>>, vector<16x128xf32>,
    } else {
    }
    return
  }
  func.func @transform_0(%arg0: i32, %arg1: i32) -> (i32, i32) {
    %c0_i32 = arith.constant 0 : i32
    %c0_i32_0 = arith.constant 0 : i32
    return %arg0, %c0_i32 : i32, i32
  }
  func.func @transform_1(%arg0: i32, %arg1: i32) -> (i32, i32, i32) {
    %c0_i32 = arith.constant 0 : i32
    %c0_i32_0 = arith.constant 0 : i32
    %c0_i32_1 = arith.constant 0 : i32
    return %arg1, %c0_i32, %c0_i32_0 : i32, i32, i32
  }
  func.func @transform_2(%arg0: i32, %arg1: i32) -> (i32, i32, i32) {
    %c0_i32 = arith.constant 0 : i32
    %c0_i32_0 = arith.constant 0 : i32
    %c0_i32_1 = arith.constant 0 : i32
    return %arg1, %c0_i32, %c0_i32_0 : i32, i32, i32
  }
  func.func @transform_3(%arg0: i32, %arg1: i32) -> (i32, i32) {
    %c0_i32 = arith.constant 0 : i32
    %c0_i32_0 = arith.constant 0 : i32
    return %arg0, %c0_i32 : i32, i32
  }
}

</mosaic_0001>

<bundles_post_ra>
// kernel: _glu_forward_impl.1
= control target key start
LH: loop header
LB: loop body
LE: loop exit
PB: predicated region body
PF: predicated region fallthrough
CT: control target
= control target key end

     0   :  { %8 = vsyncpa [#allocation4], 0  ;;  %s806_s0 = inlined_call_operand.vmem [shape: bf16[16,128], index: 0, kind: input, shape index: {}]   ;;  %s807_s1 = inlined_call_operand.hbm [shape: bf16[1,128,512], index: 1, kind: input, shape index: {}]   ;;  %s808_s2 = inlined_call_operand.hbm [shape: bf16[1,256,128], index: 2, kind: input, shape index: {}]   ;;  %s809_s3 = inlined_call_operand.vmem [shape: f32[16,128], index: 3, kind: output, shape index: {}]  }
   0x1   :  { %9 = vsyncpa [#allocation6], 0  ;;  %s764_s12 = smov [#allocation3]  }
   0x2   :  { %s17_s13 = sshll.u32 %s764_s12, 4  ;;  %s18_s13 = int_to_ptr.vmem [resolvable:$true] %s17_s13 }
   0x3   :  { %s728_s14 = scalar_lea.vmem %s18_s13, 4096  ;;  %p733_p1 = scmp.lt.s32.totalorder %s18_s13, %s18_s13 }
   0x4   :  { %p729_p0 = scmp.ne.s32.totalorder %s18_s13, %s728_s14  ;;  %p734_p2 = scmp.lt.s32.totalorder %s728_s14, %s728_s14 }
   0x6   :  { %p735_p3 = por %p734_p2, %p733_p1 }
   0x8   :  { %p736_p4 = pnand %p735_p3, %p729_p0 }
   0xa   :  { %739 = shalt.err (!%p736_p4)
}
   0xb   :  { %s765_s15 = smov 256   ;;  %s766_s16 = smov 16  }
   0xc   :  { %23 = dma.hbm_to_vmem [thread:$0]  %s807_s1, 4096, %s18_s13, [#allocation4], %s765_s15, %s765_s15, %s766_s16  }
   0xd   :  { %s767_s19 = smov [#allocation5]  }
   0xe   :  { %s29_s20 = sshll.u32 %s767_s19, 4  ;;  %s30_s20 = int_to_ptr.vmem [resolvable:$true] %s29_s20 }
   0xf   :  { %s748_s21 = scalar_lea.vmem %s30_s20, 2048  ;;  %p753_p6 = scmp.lt.s32.totalorder %s30_s20, %s30_s20 }
  0x10   :  { %p749_p5 = scmp.ne.s32.totalorder %s30_s20, %s748_s21  ;;  %p754_p7 = scmp.lt.s32.totalorder %s748_s21, %s748_s21 }
  0x12   :  { %p755_p8 = por %p754_p7, %p753_p6 }
  0x14   :  { %p756_p9 = pnand %p755_p8, %p749_p5 }
  0x16   :  { %759 = shalt.err (!%p756_p9)
}
  0x17   :  { %s768_s22 = smov 64   ;;  %s769_s23 = smov 4  }
  0x18   :  { %35 = dma.hbm_to_vmem [thread:$0]  %s808_s2, 2048, %s30_s20, [#allocation6], %s768_s22, %s768_s22, %s769_s23  }
  0x19   :  { %760 = dma.done.wait [#allocation4], 4096  }
  0x1a   :  { %761 = vsyncadd [#allocation4], 4294963200 }
  0x1b   :  { %762 = dma.done.wait [#allocation6], 2048  }
  0x1c   :  { %763 = vsyncadd [#allocation6], 4294965248  ;;  %v770_v0 = vmov 0   ;;  %v639_v1 = vld [vmem:[#allocation3 + $0xe4] ss:$16 sps:$4 sm:$0xff]   ;;  %v688_v34 = vld [vmem:[#allocation5 + $0x78] sm:$0xff]  }
  0x1d   :  { %281 = vmatprep.mubr.bf16.mxu0 %v770_v0  ;;  %324 = vmatprep.mubr.bf16.mxu1 %v770_v0  ;;  %v641_v2 = vld [vmem:[#allocation3 + $0xe0] ss:$16 sps:$4 sm:$0xff]   ;;  %v642_v3 = vld [vmem:[#allocation3 + $0xc4] ss:$16 sps:$4 sm:$0xff]   ;;  %v662_v9 = vld [vmem:[#allocation3 + $0xec] ss:$16 sps:$4 sm:$0xff]  }
  0x1e   :  { %249 = vmatprep.subr.bf16.mxu0 %v639_v1  ;;  %v644_v4 = vld [vmem:[#allocation3 + $0xc0] ss:$16 sps:$4 sm:$0xff]   ;;  %v645_v5 = vld [vmem:[#allocation3 + $0xa4] ss:$16 sps:$4 sm:$0xff]   ;;  %v665_v10 = vld [vmem:[#allocation3 + $0xe8] ss:$16 sps:$4 sm:$0xff]   ;;  %292 = vmatprep.subr.bf16.mxu1 %v662_v9 }
  0x1f   :  { %250 = vmatpush1.bf16.msra.mxu0 %v641_v2  ;;  %v647_v6 = vld [vmem:[#allocation3 + $0xa0] ss:$16 sps:$4 sm:$0xff]   ;;  %v648_v7 = vld [vmem:[#allocation3 + $0x84] ss:$16 sps:$4 sm:$0xff]   ;;  %v667_v12 = vld [vmem:[#allocation3 + $0xcc] ss:$16 sps:$4 sm:$0xff]   ;;  %293 = vmatpush1.bf16.msra.mxu1 %v665_v10 }
  0x20   :  { %251 = vmatprep.subr.bf16.mxu0 %v642_v3  ;;  %v650_v8 = vld [vmem:[#allocation3 + $0x80] ss:$16 sps:$4 sm:$0xff]   ;;  %v651_v11 = vld [vmem:[#allocation3 + $0x64] ss:$16 sps:$4 sm:$0xff]   ;;  %v669_v13 = vld [vmem:[#allocation3 + $0xc8] ss:$16 sps:$4 sm:$0xff]   ;;  %294 = vmatprep.subr.bf16.mxu1 %v667_v12 }
  0x21   :  { %v653_v14 = vld [vmem:[#allocation3 + $0x60] ss:$16 sps:$4 sm:$0xff]   ;;  %v670_v15 = vld [vmem:[#allocation3 + $0xac] ss:$16 sps:$4 sm:$0xff]   ;;  %v654_v16 = vld [vmem:[#allocation3 + $0x44] ss:$16 sps:$4 sm:$0xff]  }
  0x22   :  { %v672_v17 = vld [vmem:[#allocation3 + $0xa8] ss:$16 sps:$4 sm:$0xff]   ;;  %v656_v18 = vld [vmem:[#allocation3 + $0x40] ss:$16 sps:$4 sm:$0xff]   ;;  %v673_v19 = vld [vmem:[#allocation3 + $0x8c] ss:$16 sps:$4 sm:$0xff]  }
  0x23   :  { %252 = vmatpush1.bf16.msra.mxu0 %v644_v4  ;;  %295 = vmatpush1.bf16.msra.mxu1 %v669_v13  ;;  %v657_v20 = vld [vmem:[#allocation3 + $0x24] ss:$16 sps:$4 sm:$0xff]   ;;  %v659_v21 = vld [vmem:[#allocation3 + $0x20] ss:$16 sps:$4 sm:$0xff]   ;;  %v675_v22 = vld [vmem:[#allocation3 + $0x88] ss:$16 sps:$4 sm:$0xff]  }
  0x24   :  { %253 = vmatprep.subr.bf16.mxu0 %v645_v5  ;;  %296 = vmatprep.subr.bf16.mxu1 %v670_v15  ;;  %v660_v23 = vld [vmem:[#allocation3 + $0x4] ss:$16 sps:$4 sm:$0xff]   ;;  %v676_v24 = vld [vmem:[#allocation3 + $0x6c] ss:$16 sps:$4 sm:$0xff]   ;;  %v678_v25 = vld [vmem:[#allocation3 + $0x68] ss:$16 sps:$4 sm:$0xff]  }
  0x25   :  { %v664_v26 = vld [vmem:[#allocation3] ss:$16 sps:$4 sm:$0xff]   ;;  %v679_v27 = vld [vmem:[#allocation3 + $0x4c] ss:$16 sps:$4 sm:$0xff]   ;;  %v681_v29 = vld [vmem:[#allocation3 + $0x48] ss:$16 sps:$4 sm:$0xff]  }
  0x26   :  { %v666_v28 = vld [vmem:[%s806_s0] sm:$0xff]   ;;  %v682_v30 = vld [vmem:[#allocation3 + $0x2c] ss:$16 sps:$4 sm:$0xff]   ;;  %v684_v31 = vld [vmem:[#allocation3 + $0x28] ss:$16 sps:$4 sm:$0xff]  }
  0x27   :  { %254 = vmatpush1.bf16.msra.mxu0 %v647_v6  ;;  %297 = vmatpush1.bf16.msra.mxu1 %v672_v17  ;;  %v685_v32 = vld [vmem:[#allocation3 + $0xc] ss:$16 sps:$4 sm:$0xff]   ;;  %v687_v33 = vld [vmem:[#allocation3 + $0x8] ss:$16 sps:$4 sm:$0xff]   ;;  %v690_v36 = vld [vmem:[#allocation5 + $0x70] sm:$0xff]  }
  0x28   :  { %255 = vmatprep.subr.bf16.mxu0 %v648_v7  ;;  %298 = vmatprep.subr.bf16.mxu1 %v673_v19  ;;  %v689_v35 = vld [vmem:[#allocation5 + $0x38] sm:$0xff]   ;;  %v691_v37 = vld [vmem:[#allocation5 + $0x30] sm:$0xff]   ;;  %v692_v38 = vld [vmem:[#allocation5 + $0x68] sm:$0xff]  }
  0x29   :  { %v693_v39 = vld [vmem:[#allocation5 + $0x28] sm:$0xff]   ;;  %v694_v40 = vld [vmem:[#allocation5 + $0x60] sm:$0xff]   ;;  %v696_v42 = vld [vmem:[#allocation5 + $0x58] sm:$0xff]  }
  0x2a   :  { %v695_v41 = vld [vmem:[#allocation5 + $0x20] sm:$0xff]   ;;  %v697_v43 = vld [vmem:[#allocation5 + $0x18] sm:$0xff]   ;;  %v698_v44 = vld [vmem:[#allocation5 + $0x50] sm:$0xff]  }
  0x2b   :  { %256 = vmatpush1.bf16.msra.mxu0 %v650_v8  ;;  %299 = vmatpush1.bf16.msra.mxu1 %v675_v22  ;;  %v699_v45 = vld [vmem:[#allocation5 + $0x10] sm:$0xff]   ;;  %v700_v46 = vld [vmem:[#allocation5 + $0x48] sm:$0xff]   ;;  %v702_v48 = vld [vmem:[#allocation5 + $0x40] sm:$0xff]  }
  0x2c   :  { %257 = vmatprep.subr.bf16.mxu0 %v651_v11  ;;  %300 = vmatprep.subr.bf16.mxu1 %v676_v24  ;;  %v701_v47 = vld [vmem:[#allocation5 + $0x8] sm:$0xff]   ;;  %v703_v49 = vld [vmem:[#allocation5] sm:$0xff]  }
  0x2f   :  { %258 = vmatpush1.bf16.msra.mxu0 %v653_v14  ;;  %301 = vmatpush1.bf16.msra.mxu1 %v678_v25 }
  0x30   :  { %259 = vmatprep.subr.bf16.mxu0 %v654_v16  ;;  %302 = vmatprep.subr.bf16.mxu1 %v679_v27 }
  0x33   :  { %260 = vmatpush1.bf16.msra.mxu0 %v656_v18  ;;  %303 = vmatpush1.bf16.msra.mxu1 %v681_v29 }
  0x34   :  { %261 = vmatprep.subr.bf16.mxu0 %v657_v20  ;;  %304 = vmatprep.subr.bf16.mxu1 %v682_v30 }
  0x37   :  { %262 = vmatpush1.bf16.msra.mxu0 %v659_v21  ;;  %305 = vmatpush1.bf16.msra.mxu1 %v684_v31 }
  0x38   :  { %263 = vmatprep.subr.bf16.mxu0 %v660_v23  ;;  %306 = vmatprep.subr.bf16.mxu1 %v685_v32 }
  0x3b   :  { %264 = vmatpush1.bf16.msra.mxu0 %v664_v26  ;;  %307 = vmatpush1.bf16.msra.mxu1 %v687_v33 }
  0x3c   :  { %610 = vmatprep.subr.bf16.mxu0 %v688_v34 }
  0x3e   :  { %282 = vmatmul.mubr.bf16.vlgmr.msra.gmra.mxu0 %v666_v28  ;;  %325 = vmatmul.mubr.bf16.vlgmr.msra.gmra.mxu1 %v666_v28 }
  0x3f   :  { %611 = vmatpush3.bf16.msra.mxu0 %v689_v35 }
  0x40   :  { %612 = vmatprep.subr.bf16.mxu0 %v690_v36 }
  0x43   :  { %613 = vmatpush3.bf16.msra.mxu0 %v691_v37 }
  0x44   :  { %614 = vmatprep.subr.bf16.mxu0 %v692_v38 }
  0x47   :  { %615 = vmatpush3.bf16.msra.mxu0 %v693_v39 }
  0x48   :  { %616 = vmatprep.subr.bf16.mxu0 %v694_v40 }
  0x4b   :  { %617 = vmatpush3.bf16.msra.mxu0 %v695_v41 }
  0x4c   :  { %618 = vmatprep.subr.bf16.mxu0 %v696_v42 }
  0x4f   :  { %619 = vmatpush3.bf16.msra.mxu0 %v697_v43 }
  0x50   :  { %620 = vmatprep.subr.bf16.mxu0 %v698_v44 }
  0x53   :  { %621 = vmatpush3.bf16.msra.mxu0 %v699_v45 }
  0x54   :  { %622 = vmatprep.subr.bf16.mxu0 %v700_v46 }
  0x57   :  { %623 = vmatpush3.bf16.msra.mxu0 %v701_v47 }
  0x58   :  { %624 = vmatprep.subr.bf16.mxu0 %v702_v48 }
  0x5b   :  { %625 = vmatpush3.bf16.msra.mxu0 %v703_v49 }
  0xfe   :  { %v283_v50 = vpop.f32.mrf.mxu0  ;;  %v326_v2 = vpop.f32.mrf.mxu1 }
  0xff   :  { %v590_v51 = vmul.f32 -1.442695, %v283_v50 }
 0x100   :  { %v285_v52 = vpop.f32.mrf.mxu0  ;;  %v328_v3 = vpop.f32.mrf.mxu1 }
 0x101   :  { %704 = vpow2.f32 %v590_v51  ;;  %v591_v53 = vmul.f32 -1.442695, %v285_v52 }
 0x102   :  { %v287_v54 = vpop.f32.mrf.mxu0  ;;  %v330_v7 = vpop.f32.mrf.mxu1 }
 0x103   :  { %706 = vpow2.f32 %v591_v53  ;;  %v592_v55 = vmul.f32 -1.442695, %v287_v54 }
 0x104   :  { %v289_v56 = vpop.f32.mrf.mxu0  ;;  %v332_v14 = vpop.f32.mrf.mxu1 }
 0x105   :  { %708 = vpow2.f32 %v592_v55  ;;  %v593_v57 = vmul.f32 -1.442695, %v289_v56 }
 0x107   :  { %710 = vpow2.f32 %v593_v57 }
 0x10e   :  { %v705_v58 = vpop.eup %704 }
 0x10f   :  { %v347_v60 = vadd.f32 1.0, %v705_v58 }
 0x110   :  { %v707_v59 = vpop.eup %706 }
 0x111   :  { %v348_v61 = vadd.f32 1.0, %v707_v59 }
 0x112   :  { %v709_v62 = vpop.eup %708 }
 0x113   :  { %712 = vrcp.f32 %v348_v61  ;;  %v349_v63 = vadd.f32 1.0, %v709_v62 }
 0x114   :  { %v711_v0 = vpop.eup %710  ;;  %714 = vrcp.f32 %v347_v60 }
 0x115   :  { %716 = vrcp.f32 %v349_v63  ;;  %v350_v1 = vadd.f32 1.0, %v711_v0 }
 0x117   :  { %718 = vrcp.f32 %v350_v1 }
 0x120   :  { %v713_v4 = vpop.eup %712 }
 0x121   :  { %v715_v5 = vpop.eup %714  ;;  %v360_v8 = vmul.f32 %v713_v4, %v285_v52 }
 0x122   :  { %v717_v6 = vpop.eup %716  ;;  %v359_v11 = vmul.f32 %v715_v5, %v283_v50 }
 0x123   :  { %v361_v9 = vmul.f32 %v717_v6, %v287_v54  ;;  %v364_v15 = vmul.f32 %v360_v8, %v328_v3 }
 0x124   :  { %v719_v10 = vpop.eup %718  ;;  %v363_v17 = vmul.f32 %v359_v11, %v326_v2 }
 0x125   :  { %v362_v12 = vmul.f32 %v719_v10, %v289_v56  ;;  %v365_v13 = vmul.f32 %v361_v9, %v330_v7 }
 0x127   :  { %v366_v16 = vmul.f32 %v362_v12, %v332_v14  ;;  %v369_v19 = vpack.c.bf16 %v365_v13, %v363_v17 }
 0x129   :  { %v370_v18 = vpack.c.bf16 %v366_v16, %v364_v15 }
 0x12b   :  { %531 = vmatprep.mubr.bf16.mxu0 %v370_v18 }
 0x12c   :  { %532 = vmatmul.mubr.bf16.vlgmr.msra.gmra.mxu0 %v369_v19 }
 0x1ec   :  { %v626_v20 = vpop.f32.mrf.mxu0 }
 0x1ee   :  { %v627_v21 = vpop.f32.mrf.mxu0 }
 0x1ef   :  { %v628_v22 = vadd.f32 %v627_v21, %v626_v20 }
 0x1f0   :  { %v629_v23 = vpop.f32.mrf.mxu0 }
 0x1f1   :  { %549 = vst [vmem:[%s809_s3] sm:$0xff] %v628_v22 }
 0x1f2   :  { %v630_v24 = vpop.f32.mrf.mxu0 }
 0x1f3   :  { %v631_v25 = vadd.f32 %v630_v24, %v629_v23 }
 0x1f5   :  { %550 = vst [vmem:[%s809_s3 + $0x8] sm:$0xff] %v631_v25 }
 0x1f6   :  { %555 = vsyncpa [#allocation4], 1 }
 0x1f7   :  { %556 = vsyncpa [#allocation6], 1 }

</bundles_post_ra>
